<compile_context>
chip_gen: v5e
topology: v5e:2x2
jax: 0.10.0
libtpu: 0.0.40
codegen_flags: <defaults>
</compile_context>

<pallas_src>
import jax
import jax.numpy as jnp
from jax.experimental import pallas as pl
from jax.experimental.pallas import tpu as pltpu


def _round_up(n, m):
    return pl.cdiv(n, m) * m


def encoder_kernel(x_ref, w1_ref, b1_ref, w2_ref, b2_ref, w3_ref, b3_ref, o_ref):
    # Fused 3-layer MLP: bf16 inputs on the MXU with f32 accumulation,
    # bias + ReLU on the VPU in f32, everything resident in VMEM.
    h = jnp.dot(x_ref[...], w1_ref[...], preferred_element_type=jnp.float32)
    h = jnp.maximum(h + b1_ref[...], 0.0)

    h = jnp.dot(h.astype(w2_ref.dtype), w2_ref[...],
                preferred_element_type=jnp.float32)
    h = jnp.maximum(h + b2_ref[...], 0.0)

    h = jnp.dot(h.astype(w3_ref.dtype), w3_ref[...],
                preferred_element_type=jnp.float32)
    o_ref[...] = jnp.maximum(h + b3_ref[...], 0.0).astype(o_ref.dtype)


def encoder_forward(x, params, *, tile_b=512, compute_dtype=jnp.bfloat16):
    """x: (B, 256) float32. Returns (B, 4) float32."""
    w1, b1, w2, b2, w3, b3 = params
    B, D_in = x.shape
    assert D_in == 256

    # Pick the batch tile: as large as possible (VMEM is ample — weights are
    # ~100 KiB in bf16, a double-buffered (512, 256) bf16 x tile is 512 KiB),
    # clamped to the 8-aligned batch for small inputs.  Pad B up to a multiple
    # of the tile instead of asserting divisibility.
    tile = int(min(tile_b, _round_up(B, 8)))
    B_pad = int(_round_up(B, tile))
    if B_pad != B:
        x = jnp.pad(x, ((0, B_pad - B), (0, 0)))

    # bf16 activations/weights (halve HBM traffic, MXU-native); f32 biases.
    x_c = x.astype(compute_dtype)
    w1_c, w2_c, w3_c = (w.astype(compute_dtype) for w in (w1, w2, w3))
    b1_c, b2_c, b3_c = (b.astype(jnp.float32) for b in (b1, b2, b3))

    grid = (B_pad // tile,)

    # Weights / biases are small: keep the full tensors in VMEM for every
    # batch tile (index_map always returns block (0, 0)).
    full = lambda shape: pl.BlockSpec(shape, lambda i: (0, 0))

    flops = 2 * B_pad * (256 * 128 + 128 * 64 + 64 * 4)
    bytes_accessed = (
        x_c.size * x_c.dtype.itemsize
        + sum(int(a.size) * a.dtype.itemsize
              for a in (w1_c, b1_c, w2_c, b2_c, w3_c, b3_c))
        + B_pad * 4 * 4  # f32 output
    )

    out = pl.pallas_call(
        encoder_kernel,
        out_shape=jax.ShapeDtypeStruct((B_pad, 4), jnp.float32),
        grid_spec=pltpu.PrefetchScalarGridSpec(
            num_scalar_prefetch=0,
            grid=grid,
            in_specs=[
                pl.BlockSpec((tile, 256), lambda i: (i, 0)),  # x tile
                full((256, 128)),  # w1
                full((1, 128)),    # b1
                full((128, 64)),   # w2
                full((1, 64)),     # b2
                full((64, 4)),     # w3
                full((1, 4)),      # b3
            ],
            out_specs=pl.BlockSpec((tile, 4), lambda i: (i, 0)),
        ),
        compiler_params=pltpu.CompilerParams(
            dimension_semantics=("parallel",)
        ),
        cost_estimate=pl.CostEstimate(
            flops=int(flops),
            transcendentals=0,
            bytes_accessed=int(bytes_accessed),
        ),
    )(x_c, w1_c, b1_c, w2_c, b2_c, w3_c, b3_c)

    return out[:B]


def init_params(key):
    """Deterministic init mirroring nn.Linear shapes (stored transposed)."""
    ks = jax.random.split(key, 6)

    def lin(kw, kb, fan_in, fan_out):
        bound = 1.0 / jnp.sqrt(fan_in)
        # PyTorch stores weight as (out, in); we store (in, out) for x @ W.
        w = jax.random.uniform(kw, (fan_in, fan_out), jnp.float32, -bound, bound)
        b = jax.random.uniform(kb, (1, fan_out), jnp.float32, -bound, bound)
        return w, b

    w1, b1 = lin(ks[0], ks[1], 256, 128)
    w2, b2 = lin(ks[2], ks[3], 128, 64)
    w3, b3 = lin(ks[4], ks[5], 64, 4)
    return (w1, b1, w2, b2, w3, b3)


def encoder_ref(x, params, compute_dtype=jnp.float32):
    """Pure-JAX reference, optionally mimicking the kernel's bf16 casts."""
    w1, b1, w2, b2, w3, b3 = params
    c = lambda a: a.astype(compute_dtype)
    h = jnp.dot(c(x), c(w1), preferred_element_type=jnp.float32) + b1
    h = jnp.maximum(h, 0.0)
    h = jnp.dot(c(h), c(w2), preferred_element_type=jnp.float32) + b2
    h = jnp.maximum(h, 0.0)
    h = jnp.dot(c(h), c(w3), preferred_element_type=jnp.float32) + b3
    return jnp.maximum(h, 0.0)


if __name__ == "__main__":
    key = jax.random.PRNGKey(0)
    k_x, k_p = jax.random.split(key)

    B = 10  # deliberately NOT a multiple of 8 to exercise the padding path
    x = jax.random.normal(k_x, (B, 256), dtype=jnp.float32)
    params = init_params(k_p)

    out = encoder_forward(x, params)
    out = jax.block_until_ready(out)

    # Reference with the same bf16 input/weight casts as the kernel.
    ref = encoder_ref(x, params, compute_dtype=jnp.bfloat16)

    assert out.shape == (B, 4)
    assert jnp.allclose(out, ref, atol=1e-4, rtol=1e-4), "mismatch vs reference"

    print("KERNEL_OK")
</pallas_src>

<mosaic_0001>
module attributes {stable_mosaic.version = 11 : i64} {
  func.func @encoder_kernel(%arg0: i32, %arg1: memref<16x256xbf16, #tpu.memory_space<vmem>>, %arg2: memref<256x128xbf16, #tpu.memory_space<vmem>>, %arg3: memref<1x128xf32, #tpu.memory_space<vmem>>, %arg4: memref<128x64xbf16, #tpu.memory_space<vmem>>, %arg5: memref<1x64xf32, #tpu.memory_space<vmem>>, %arg6: memref<64x4xbf16, #tpu.memory_space<vmem>>, %arg7: memref<1x4xf32, #tpu.memory_space<vmem>>, %arg8: memref<16x4xf32, #tpu.memory_space<vmem>>) attributes {dimension_semantics = [#tpu.dimension_semantics<parallel>], iteration_bounds = array<i64: 1>, scalar_prefetch = 0 : i64, scratch_operands = 0 : i64, tpu.core_type = #tpu.core_type<tc>, window_params = [{transform_indices = @transform_0, window_bounds = array<i64: 16, 256>}, {pipeline_mode = #tpu.pipeline_mode<synchronous>, transform_indices = @transform_1, window_bounds = array<i64: 256, 128>}, {pipeline_mode = #tpu.pipeline_mode<synchronous>, transform_indices = @transform_2, window_bounds = array<i64: 1, 128>}, {pipeline_mode = #tpu.pipeline_mode<synchronous>, transform_indices = @transform_3, window_bounds = array<i64: 128, 64>}, {pipeline_mode = #tpu.pipeline_mode<synchronous>, transform_indices = @transform_4, window_bounds = array<i64: 1, 64>}, {pipeline_mode = #tpu.pipeline_mode<synchronous>, transform_indices = @transform_5, window_bounds = array<i64: 64, 4>}, {pipeline_mode = #tpu.pipeline_mode<synchronous>, transform_indices = @transform_6, window_bounds = array<i64: 1, 4>}, {transform_indices = @transform_7, window_bounds = array<i64: 16, 4>}]} {
    %c0 = arith.constant 0 : index
    %c0_0 = arith.constant 0 : index
    %0 = vector.load %arg1[%c0, %c0_0] : memref<16x256xbf16, #tpu.memory_space<vmem>>, vector<16x256xbf16>
    %c0_1 = arith.constant 0 : index
    %c0_2 = arith.constant 0 : index
    %1 = vector.load %arg2[%c0_1, %c0_2] : memref<256x128xbf16, #tpu.memory_space<vmem>>, vector<256x128xbf16>
    %cst = arith.constant dense<0.000000e+00> : vector<16x128xf32>
    %2 = tpu.matmul %0, %1, %cst {dimension_numbers = #tpu.dot_dimension_numbers<[1], [0], [0], [1], [0, 0, 1, 1], [], []>} : vector<16x256xbf16>, vector<256x128xbf16>, vector<16x128xf32> -> vector<16x128xf32>
    %c0_3 = arith.constant 0 : index
    %c0_4 = arith.constant 0 : index
    %3 = vector.load %arg3[%c0_3, %c0_4] : memref<1x128xf32, #tpu.memory_space<vmem>>, vector<1x128xf32>
    %4 = vector.broadcast %3 : vector<1x128xf32> to vector<16x128xf32>
    %5 = arith.addf %2, %4 : vector<16x128xf32>
    %cst_5 = arith.constant 0.000000e+00 : f32
    %6 = vector.broadcast %cst_5 : f32 to vector<16x128xf32>
    %7 = arith.maximumf %5, %6 : vector<16x128xf32>
    %8 = arith.truncf %7 : vector<16x128xf32> to vector<16x128xbf16>
    %c0_6 = arith.constant 0 : index
    %c0_7 = arith.constant 0 : index
    %9 = vector.load %arg4[%c0_6, %c0_7] : memref<128x64xbf16, #tpu.memory_space<vmem>>, vector<128x64xbf16>
    %cst_8 = arith.constant dense<0.000000e+00> : vector<16x64xf32>
    %10 = tpu.matmul %8, %9, %cst_8 {dimension_numbers = #tpu.dot_dimension_numbers<[1], [0], [0], [1], [0, 0, 1, 1], [], []>} : vector<16x128xbf16>, vector<128x64xbf16>, vector<16x64xf32> -> vector<16x64xf32>
    %c0_9 = arith.constant 0 : index
    %c0_10 = arith.constant 0 : index
    %11 = vector.load %arg5[%c0_9, %c0_10] : memref<1x64xf32, #tpu.memory_space<vmem>>, vector<1x64xf32>
    %12 = vector.broadcast %11 : vector<1x64xf32> to vector<16x64xf32>
    %13 = arith.addf %10, %12 : vector<16x64xf32>
    %cst_11 = arith.constant 0.000000e+00 : f32
    %14 = vector.broadcast %cst_11 : f32 to vector<16x64xf32>
    %15 = arith.maximumf %13, %14 : vector<16x64xf32>
    %16 = arith.truncf %15 : vector<16x64xf32> to vector<16x64xbf16>
    %c0_12 = arith.constant 0 : index
    %c0_13 = arith.constant 0 : index
    %17 = vector.load %arg6[%c0_12, %c0_13] : memref<64x4xbf16, #tpu.memory_space<vmem>>, vector<64x4xbf16>
    %cst_14 = arith.constant dense<0.000000e+00> : vector<16x4xf32>
    %18 = tpu.matmul %16, %17, %cst_14 {dimension_numbers = #tpu.dot_dimension_numbers<[1], [0], [0], [1], [0, 0, 1, 1], [], []>} : vector<16x64xbf16>, vector<64x4xbf16>, vector<16x4xf32> -> vector<16x4xf32>
    %c0_15 = arith.constant 0 : index
    %c0_16 = arith.constant 0 : index
    %19 = vector.load %arg7[%c0_15, %c0_16] : memref<1x4xf32, #tpu.memory_space<vmem>>, vector<1x4xf32>
    %20 = vector.broadcast %19 : vector<1x4xf32> to vector<16x4xf32>
    %21 = arith.addf %18, %20 : vector<16x4xf32>
    %cst_17 = arith.constant 0.000000e+00 : f32
    %22 = vector.broadcast %cst_17 : f32 to vector<16x4xf32>
    %23 = arith.maximumf %21, %22 : vector<16x4xf32>
    %c0_18 = arith.constant 0 : index
    %c0_19 = arith.constant 0 : index
    %24 = vector.load %arg8[%c0_18, %c0_19] : memref<16x4xf32, #tpu.memory_space<vmem>>, vector<16x4xf32>
    tpu.vector_store %arg8[%c0_18, %c0_19], %23 {strides = array<i32>} : memref<16x4xf32, #tpu.memory_space<vmem>>, vector<16x4xf32>,
    return
  }
  func.func @transform_0(%arg0: i32) -> (i32, i32) {
    %c0_i32 = arith.constant 0 : i32
    %c0_i32_0 = arith.constant 0 : i32
    return %arg0, %c0_i32 : i32, i32
  }
  func.func @transform_1(%arg0: i32) -> (i32, i32) {
    %c0_i32 = arith.constant 0 : i32
    %c0_i32_0 = arith.constant 0 : i32
    %c0_i32_1 = arith.constant 0 : i32
    return %c0_i32, %c0_i32_0 : i32, i32
  }
  func.func @transform_2(%arg0: i32) -> (i32, i32) {
    %c0_i32 = arith.constant 0 : i32
    %c0_i32_0 = arith.constant 0 : i32
    %c0_i32_1 = arith.constant 0 : i32
    return %c0_i32, %c0_i32_0 : i32, i32
  }
  func.func @transform_3(%arg0: i32) -> (i32, i32) {
    %c0_i32 = arith.constant 0 : i32
    %c0_i32_0 = arith.constant 0 : i32
    %c0_i32_1 = arith.constant 0 : i32
    return %c0_i32, %c0_i32_0 : i32, i32
  }
  func.func @transform_4(%arg0: i32) -> (i32, i32) {
    %c0_i32 = arith.constant 0 : i32
    %c0_i32_0 = arith.constant 0 : i32
    %c0_i32_1 = arith.constant 0 : i32
    return %c0_i32, %c0_i32_0 : i32, i32
  }
  func.func @transform_5(%arg0: i32) -> (i32, i32) {
    %c0_i32 = arith.constant 0 : i32
    %c0_i32_0 = arith.constant 0 : i32
    %c0_i32_1 = arith.constant 0 : i32
    return %c0_i32, %c0_i32_0 : i32, i32
  }
  func.func @transform_6(%arg0: i32) -> (i32, i32) {
    %c0_i32 = arith.constant 0 : i32
    %c0_i32_0 = arith.constant 0 : i32
    %c0_i32_1 = arith.constant 0 : i32
    return %c0_i32, %c0_i32_0 : i32, i32
  }
  func.func @transform_7(%arg0: i32) -> (i32, i32) {
    %c0_i32 = arith.constant 0 : i32
    %c0_i32_0 = arith.constant 0 : i32
    return %arg0, %c0_i32 : i32, i32
  }
}

</mosaic_0001>

<bundles_post_ra>
// kernel: tpu_custom_call.1
= control target key start
LH: loop header
LB: loop body
LE: loop exit
PB: predicated region body
PF: predicated region fallthrough
CT: control target
= control target key end

     0   :  { %12 = vsyncpa [#allocation3], 0  ;;  %s550_s27 = smov [#allocation2]   ;;  %s551_s29 = smov 128   ;;  %s695_s0 = inlined_call_operand.hbm [shape: bf16[16,256], index: 0, kind: input, shape index: {}]   ;;  %s696_s1 = inlined_call_operand.vmem [shape: bf16[256,128], index: 1, kind: input, shape index: {}]   ;;  %s697_s2 = inlined_call_operand.vmem [shape: f32[1,128], index: 2, kind: input, shape index: {}]   ;;  %s698_s3 = inlined_call_operand.vmem [shape: bf16[128,64], index: 3, kind: input, shape index: {}]   ;;  %s699_s4 = inlined_call_operand.vmem [shape: f32[1,64], index: 4, kind: input, shape index: {}]   ;;  %s700_s5 = inlined_call_operand.vmem [shape: bf16[64,4], index: 5, kind: input, shape index: {}]   ;;  %s701_s6 = inlined_call_operand.vmem [shape: f32[1,4], index: 6, kind: input, shape index: {}]   ;;  %s702_s7 = inlined_call_operand.vmem [shape: f32[16,4], index: 7, kind: output, shape index: {}]  }
   0x1   :  { %s17_s26 = sshll.u32 %s695_s0, 4  ;;  %s19_s28 = sshll.u32 %s550_s27, 4  ;;  %s18_s26 = int_to_ptr.hbm [resolvable:$true] %s17_s26  ;;  %s20_s28 = int_to_ptr.vmem [resolvable:$true] %s19_s28 }
   0x2   :  { %s552_s30 = smov 8  }
   0x3   :  { %25 = dma.hbm_to_vmem [thread:$0]  %s18_s26, 256, %s20_s28, [#allocation3], %s551_s29, %s551_s29, %s552_s30  }
   0x4   :  { %548 = dma.done.wait [#allocation3], 256  }
   0x5   :  { %549 = vsyncadd [#allocation3], 4294967040  ;;  %v497_v0 = vld [vmem:[%s696_s1 + $0x38] sm:$0xff]  ;;  %v496_v2 = vld [vmem:[%s696_s1 + $0x30] sm:$0xff]  ;;  %vm339_vm0 = vcmask 523264   ;;  %vm359_vm1 = vcmask 31744  }
   0x6   :  { %v505_v1 = vld [vmem:[%s696_s1 + $0x78] sm:$0xff]  ;;  %187 = vmatpush.bf16.msra.mxu0 %v497_v0  ;;  %v504_v3 = vld [vmem:[%s696_s1 + $0x70] sm:$0xff]  ;;  %v495_v4 = vld [vmem:[%s696_s1 + $0x28] sm:$0xff] }
   0x7   :  { %201 = vmatpush.bf16.msra.mxu1 %v505_v1  ;;  %v503_v5 = vld [vmem:[%s696_s1 + $0x68] sm:$0xff]  ;;  %v513_v6 = vld [vmem:[%s698_s3 + $0x38] sm:$0xff]  ;;  %v512_v7 = vld [vmem:[%s698_s3 + $0x30] sm:$0xff] }
   0x8   :  { %286 = vmatpush.bf16.msra.mxu2 %v513_v6  ;;  %v494_v8 = vld [vmem:[%s696_s1 + $0x20] sm:$0xff]  ;;  %v511_v10 = vld [vmem:[%s698_s3 + $0x28] sm:$0xff]  ;;  %v493_v11 = vld [vmem:[%s696_s1 + $0x18] sm:$0xff] }
   0x9   :  { %v502_v9 = vld [vmem:[%s696_s1 + $0x60] sm:$0xff]  ;;  %v501_v12 = vld [vmem:[%s696_s1 + $0x58] sm:$0xff]  ;;  %v492_v14 = vld [vmem:[%s696_s1 + $0x10] sm:$0xff] }
   0xa   :  { %188 = vmatpush.bf16.msra.mxu0 %v496_v2  ;;  %v510_v13 = vld [vmem:[%s698_s3 + $0x20] sm:$0xff]  ;;  %v500_v15 = vld [vmem:[%s696_s1 + $0x50] sm:$0xff]  ;;  %v491_v16 = vld [vmem:[%s696_s1 + $0x8] sm:$0xff] }
   0xb   :  { %202 = vmatpush.bf16.msra.mxu1 %v504_v3  ;;  %v499_v17 = vld [vmem:[%s696_s1 + $0x48] sm:$0xff]  ;;  %v490_v18 = vld [vmem:[%s696_s1] sm:$0xff]  ;;  %v509_v26 = vld [vmem:[%s698_s3 + $0x18] sm:$0xff] }
   0xc   :  { %287 = vmatpush.bf16.msra.mxu2 %v512_v7  ;;  %v498_v19 = vld [vmem:[%s696_s1 + $0x40] sm:$0xff]  ;;  %v489_v21 = vld [vmem:[#allocation2 + $0x4] sm:$0xf0]  ;;  %v371_v23 = vld [vmem:[#allocation2 + $0x8] sm:$0xf0] }
   0xd   :  { %v369_v20 = vld [vmem:[#allocation2] sm:$0xf]  ;;  %v488_v22 = vld [vmem:[#allocation2 + $0x4] sm:$0xf]  ;;  %v508_v27 = vld [vmem:[%s698_s3 + $0x10] sm:$0xff] }
   0xe   :  { %189 = vmatpush.bf16.msra.mxu0 %v495_v4  ;;  %v370_v24 = vor.u32 %v489_v21, %v369_v20  ;;  %v374_v25 = vor.u32 %v488_v22, %v371_v23  ;;  %v507_v28 = vld [vmem:[%s698_s3 + $0x8] sm:$0xff]  ;;  %v506_v29 = vld [vmem:[%s698_s3] sm:$0xff]  ;;  %v517_v42 = vld [vmem:[%s700_s5 + $0x18] sm:$0xff] }
   0xf   :  { %203 = vmatpush.bf16.msra.mxu1 %v503_v5  ;;  %v521_v32 = vld [vmem:[%s697_s2] ss:$0 sm:$0xff]  ;;  %347 = vmatpush.bf16.msra.mxu3 %v517_v42  ;;  %v516_v43 = vld [vmem:[%s700_s5 + $0x10] sm:$0xff]  ;;  %v515_v44 = vld [vmem:[%s700_s5 + $0x8] sm:$0xff] }
  0x10   :  { %288 = vmatpush.bf16.msra.mxu2 %v511_v10  ;;  %v514_v45 = vld [vmem:[%s700_s5] sm:$0xff] }
  0x11   :  { %v522_v47 = vld [vmem:[%s699_s4] ss:$0 sm:$0xff] }
  0x12   :  { %190 = vmatpush.bf16.msra.mxu0 %v494_v8  ;;  %v523_v54 = vld [vmem:[%s701_s6] ss:$0 sm:$0xff] }
  0x13   :  { %204 = vmatpush.bf16.msra.mxu1 %v502_v9  ;;  %348 = vmatpush.bf16.msra.mxu3 %v516_v43 }
  0x14   :  { %289 = vmatpush.bf16.msra.mxu2 %v510_v13 }
  0x16   :  { %191 = vmatpush.bf16.msra.mxu0 %v493_v11 }
  0x17   :  { %205 = vmatpush.bf16.msra.mxu1 %v501_v12  ;;  %349 = vmatpush.bf16.msra.mxu3 %v515_v44 }
  0x18   :  { %290 = vmatpush.bf16.msra.mxu2 %v509_v26 }
  0x1a   :  { %192 = vmatpush.bf16.msra.mxu0 %v492_v14 }
  0x1b   :  { %206 = vmatpush.bf16.msra.mxu1 %v500_v15  ;;  %350 = vmatpush.bf16.msra.mxu3 %v514_v45 }
  0x1c   :  { %291 = vmatpush.bf16.msra.mxu2 %v508_v27 }
  0x1e   :  { %193 = vmatpush.bf16.msra.mxu0 %v491_v16 }
  0x1f   :  { %207 = vmatpush.bf16.msra.mxu1 %v499_v17 }
  0x20   :  { %292 = vmatpush.bf16.msra.mxu2 %v507_v28 }
  0x22   :  { %194 = vmatpush.bf16.msra.mxu0 %v490_v18 }
  0x23   :  { %208 = vmatpush.bf16.msra.mxu1 %v498_v19 }
  0x24   :  { %293 = vmatpush.bf16.msra.mxu2 %v506_v29 }
  0x25   :  { %195 = vmatmul.bf16.vlgmr.msra.gmra.mxu0 %v370_v24 }
  0x26   :  { %209 = vmatmul.bf16.vlgmr.msra.gmra.mxu1 %v374_v25 }
  0xa2   :  { %v196_v30 = vpop.f32.mrf.mxu0 }
  0xa3   :  { %v210_v31 = vpop.f32.mrf.mxu1  ;;  %v197_v33 = vadd.f32 %v521_v32, %v196_v30 }
  0xa5   :  { %v211_v35 = vadd.f32 %v210_v31, %v197_v33 }
  0xa7   :  { %v215_v39 = vmax.f32 %v211_v35, 0.0 }
  0xaa   :  { %v198_v34 = vpop.f32.mrf.mxu0 }
  0xab   :  { %v199_v36 = vadd.f32 %v521_v32, %v198_v34  ;;  %v212_v37 = vpop.f32.mrf.mxu1 }
  0xad   :  { %v213_v38 = vadd.f32 %v212_v37, %v199_v36 }
  0xaf   :  { %v216_v40 = vmax.f32 %v213_v38, 0.0 }
  0xb1   :  { %v217_v41 = vpack.c.bf16 %v216_v40, %v215_v39 }
  0xb3   :  { %294 = vmatmul.bf16.vlgmr.msra.gmra.mxu2 %v217_v41 }
 0x136   :  { %v295_v46 = vpop.f32.mrf.mxu2 }
 0x137   :  { %v296_v48 = vadd.f32 %v522_v47, %v295_v46 }
 0x139   :  { %v300_v51 = vmax.f32 %v296_v48, 0.0 }
 0x13e   :  { %v297_v49 = vpop.f32.mrf.mxu2 }
 0x13f   :  { %v298_v50 = vadd.f32 %v522_v47, %v297_v49 }
 0x141   :  { %v301_v52 = vmax.f32 %v298_v50, 0.0 }
 0x143   :  { %v302_v53 = vpack.c.bf16 %v301_v52, %v300_v51 }
 0x145   :  { %487 = vmatmul.msk.bf16.vlgmr.msra.gmra.mxu3 %vm339_vm0, %v302_v53 }
 0x1c8   :  { %v352_v55 = vpop.f32.mrf.mxu3 }
 0x1c9   :  { %v353_v56 = vadd.f32 %v523_v54, %v352_v55 }
 0x1cb   :  { %v357_v57 = vmax.f32 %v353_v56, 0.0 }
 0x1cd   :  { %360 = vst.msk [vmem:[%s702_s7] sm:$0xff] %vm359_vm1, %v357_v57 }
 0x1d0   :  { %v354_v58 = vpop.f32.mrf.mxu3 }
 0x1d1   :  { %v355_v59 = vadd.f32 %v523_v54, %v354_v58 }
 0x1d3   :  { %v358_v60 = vmax.f32 %v355_v59, 0.0 }
 0x1d5   :  { %361 = vst.msk [vmem:[%s702_s7 + $0x8] sm:$0xff] %vm359_vm1, %v358_v60 }
 0x1d6   :  { %366 = vsyncpa [#allocation3], 1 }

</bundles_post_ra>
